<compile_context>
chip_gen: v7x
topology: tpu7x:2x2x1
jax: 0.10.0
libtpu: 0.0.40
codegen_flags: <defaults>
</compile_context>

<pallas_src>
import functools

import jax
import jax.numpy as jnp
from jax.experimental import pallas as pl
from jax.experimental.pallas import tpu as pltpu

_MIB = 1024 * 1024


def _vmem_budget_bytes():
    """Generation-aware VMEM budget used to size the lane tile."""
    try:
        cap = int(pltpu.get_tpu_info().vmem_capacity_bytes)
    except Exception:
        cap = 64 * _MIB  # conservative fallback (v7x per-core capacity)
    # ~65% of VMEM, hard-capped at 48 MiB: ~41 MiB on v7x (64 MiB VMEM),
    # 48 MiB on v5e/v6e (128 MiB VMEM, above the 16/32 MiB default scoped
    # limits -> we also raise vmem_limit_bytes below).
    return max(8 * _MIB, min(int(cap * 0.65), 48 * _MIB))


def _per_pixel_focal(x, t, *, gamma, ignore_index, hw, tile, tile_idx):
    """Per-pixel focal loss for one (C, T) tile.

    x: (C, T) logits (any float dtype), t: (1, T) int32 targets.
    Returns (loss, valid): (1, T) f32 loss (0.0 at ignored / out-of-range
    lanes) and the (1, T) bool valid mask.
    """
    x = x.astype(jnp.float32)
    C, T = x.shape

    # Lanes past the true pixel count (ragged / redundant tile) act as ignored.
    lane = jax.lax.broadcasted_iota(jnp.int32, (1, T), 1)
    in_bounds = (tile_idx * tile + lane) < hw
    valid = jnp.logical_and(in_bounds, t != ignore_index)
    t_safe = jnp.where(valid, t, 0)

    # Bool class-selection mask; no f32 one-hot materialized.
    c_idx = jax.lax.broadcasted_iota(jnp.int32, (C, T), 0)
    sel = c_idx == t_safe                                    # (C, T) bool

    # Numerically stable softmax pieces over the class (sublane) axis.
    m = jnp.max(x, axis=0, keepdims=True)                    # (1, T)
    x_t = jnp.sum(jnp.where(sel, x, 0.0), axis=0, keepdims=True)
    z = x - m
    e = jnp.exp(z)                                           # C exps / pixel (EUP)
    s = jnp.sum(e, axis=0, keepdims=True)                    # (1, T)
    e_t = jnp.sum(jnp.where(sel, e, 0.0), axis=0, keepdims=True)
    z_t = x_t - m

    # p_t from existing exp(z): approx EUP reciprocal + one Newton step on the
    # VPU (error ~1e-7) instead of an extra full-width exp or exact divide.
    r = pl.reciprocal(s, approx=True)
    r = r * (2.0 - s * r)
    p = e_t * r

    ce = jnp.log(s) - z_t                                    # -log_softmax at target

    # Focal weight: small integer gamma -> multiply chain on the VPU.
    one_m_p = 1.0 - p
    g = float(gamma)
    if g == int(g) and 0 <= int(g) <= 8:
        w = jnp.ones_like(one_m_p)
        for _ in range(int(g)):
            w = w * one_m_p
    else:
        w = jnp.power(one_m_p, g)                            # generic fallback (EUP)

    loss = jnp.where(valid, w * ce, 0.0)
    return loss, valid


def _focal_reduce_kernel(x_ref, t_ref, sum_ref, cnt_ref, sum_acc, cnt_acc, *,
                         gamma, ignore_index, hw, tile, tiles_per_split):
    """Fused reduction: lane-wide partial sums / valid counts in VMEM scratch,
    lane-reduced into tiny outputs at the last lane tile of each (split, row)."""
    c = pl.program_id(0)
    i = pl.program_id(2)

    @pl.when(i == 0)
    def _():
        sum_acc[...] = jnp.zeros_like(sum_acc)
        cnt_acc[...] = jnp.zeros_like(cnt_acc)

    loss, valid = _per_pixel_focal(
        x_ref[0], t_ref[0], gamma=gamma, ignore_index=ignore_index,
        hw=hw, tile=tile, tile_idx=c * tiles_per_split + i)   # (1, T)

    sum_acc[...] += loss
    cnt_acc[...] += valid.astype(jnp.float32)                 # count valid pixels

    @pl.when(i == tiles_per_split - 1)
    def _():
        sum_ref[...] = jnp.full(sum_ref.shape, jnp.sum(sum_acc[...]), jnp.float32)
        cnt_ref[...] = jnp.full(cnt_ref.shape, jnp.sum(cnt_acc[...]), jnp.float32)


def _focal_none_kernel(x_ref, t_ref, out_ref, *, gamma, ignore_index, hw, tile):
    """reduction='none': write the per-pixel loss map."""
    i = pl.program_id(1)
    loss, _ = _per_pixel_focal(x_ref[0], t_ref[0], gamma=gamma,
                               ignore_index=ignore_index, hw=hw, tile=tile,
                               tile_idx=i)
    out_ref[...] = loss[None]


def softmax_focal_loss(x, target, gamma=2.0, ignore_index=-1,
                       reduction="mean", max_tile=None, vmem_budget=None):
    """x: [N, C, H, W] float logits, target: [N, H, W] int labels."""
    N, C, H, W = x.shape
    HW = H * W

    # Free reshapes (contiguous trailing dims): no HBM transpose, no HBM pad,
    # keep the logits dtype (per-tile upcast in the kernel).
    x3 = x.reshape(N, C, HW)
    t3 = target.reshape(N, 1, HW).astype(jnp.int32)

    in_bytes = jnp.dtype(x.dtype).itemsize
    budget = int(vmem_budget) if vmem_budget is not None else _vmem_budget_bytes()

    # Per-lane VMEM footprint: double-buffered inputs (x + targets), ~6 live
    # f32 (C, tile) temporaries (z, e, masked selects, class iota/mask, slack),
    # ~16 (1, tile) f32 row temporaries, plus the two (1, tile) f32 accumulator
    # scratches / the double-buffered 'none' output.
    bytes_per_lane = 2 * (C * in_bytes + 4) + 6 * C * 4 + 64 + 8

    tile_cap = budget // bytes_per_lane
    if max_tile is not None:
        tile_cap = min(tile_cap, int(max_tile))
    hw_pad = ((HW + 127) // 128) * 128                       # lane blocks are 128-aligned
    tile_eff = max(128, min((tile_cap // 128) * 128, hw_pad))
    n_tiles = (HW + tile_eff - 1) // tile_eff

    # Headroom over our estimate; always below physical VMEM on every gen.
    vmem_limit = int(budget + 16 * _MIB)

    static = dict(gamma=float(gamma), ignore_index=int(ignore_index),
                  hw=HW, tile=tile_eff)

    if reduction in ("mean", "sum"):
        # Split the lane-tile axis across a leading "parallel" axis so both
        # v7x TensorCores get work even when N == 1 (no-op on v5e/v6e).
        lane_splits = 2 if n_tiles >= 2 else 1
        tps = (n_tiles + lane_splits - 1) // lane_splits
        max_blk = n_tiles - 1

        def in_map(cc, n, i):
            # Clamp redundant trailing blocks (odd tile counts); the in-kernel
            # iota mask zeroes their contribution.
            return (n, 0, jnp.minimum(cc * tps + i, max_blk))

        kernel = functools.partial(_focal_reduce_kernel, **static,
                                   tiles_per_split=tps)
        sums, cnts = pl.pallas_call(
            kernel,
            out_shape=(jax.ShapeDtypeStruct((lane_splits, N, 1, 128), jnp.float32),
                       jax.ShapeDtypeStruct((lane_splits, N, 1, 128), jnp.float32)),
            grid_spec=pltpu.PrefetchScalarGridSpec(
                num_scalar_prefetch=0,
                grid=(lane_splits, N, tps),
                in_specs=[pl.BlockSpec((1, C, tile_eff), in_map),
                          pl.BlockSpec((1, 1, tile_eff), in_map)],
                out_specs=[pl.BlockSpec((1, 1, 1, 128), lambda cc, n, i: (cc, n, 0, 0)),
                           pl.BlockSpec((1, 1, 1, 128), lambda cc, n, i: (cc, n, 0, 0))],
                scratch_shapes=[pltpu.VMEM((1, tile_eff), jnp.float32),
                                pltpu.VMEM((1, tile_eff), jnp.float32)]),
            compiler_params=pltpu.CompilerParams(
                dimension_semantics=("parallel", "parallel", "arbitrary"),
                vmem_limit_bytes=vmem_limit),
        )(x3, t3)

        total = jnp.sum(sums[:, :, 0, 0])                     # tiny epilogue
        if reduction == "sum":
            return total
        count = jnp.sum(cnts[:, :, 0, 0])                     # # non-ignored pixels
        # Matches loss.sum() / count_nonzero() (equal except f32 underflow);
        # returns 0.0 if every pixel is ignored.
        return jnp.where(count > 0, total / count, jnp.float32(0.0))
    else:
        kernel = functools.partial(_focal_none_kernel, **static)
        loss = pl.pallas_call(
            kernel,
            out_shape=jax.ShapeDtypeStruct((N, 1, HW), jnp.float32),
            grid_spec=pltpu.PrefetchScalarGridSpec(
                num_scalar_prefetch=0,
                grid=(N, n_tiles),
                in_specs=[pl.BlockSpec((1, C, tile_eff), lambda n, i: (n, 0, i)),
                          pl.BlockSpec((1, 1, tile_eff), lambda n, i: (n, 0, i))],
                out_specs=pl.BlockSpec((1, 1, tile_eff), lambda n, i: (n, 0, i)),
            ),
            compiler_params=pltpu.CompilerParams(
                dimension_semantics=("parallel", "parallel"),
                vmem_limit_bytes=vmem_limit),
        )(x3, t3)
        return loss[:, 0, :].reshape(N, H, W)


def _reference_pixels(x, target, gamma=2.0, ignore_index=-1):
    """Pure-JAX per-pixel reference mirroring the PyTorch module."""
    valid = target != ignore_index
    t_safe = jnp.where(valid, target, 0)
    logp = jax.nn.log_softmax(x.astype(jnp.float32), axis=1)    # [N,C,H,W]
    logp_t = jnp.take_along_axis(logp, t_safe[:, None], axis=1)[:, 0]
    p = jnp.exp(logp_t)
    ce = jnp.where(valid, -logp_t, 0.0)
    return (1.0 - p) ** gamma * ce


if __name__ == "__main__":
    key = jax.random.PRNGKey(0)
    kx, kt, km = jax.random.split(key, 3)

    # Primary config: N=2, C=4, H=W=16 (single lane tile per batch row).
    N, C, H, W = 2, 4, 16, 16
    x = jax.random.uniform(kx, (N, C, H, W), dtype=jnp.float32)
    target = jax.random.randint(kt, (N, H, W), 0, C, dtype=jnp.int32)
    ignore_mask = jax.random.uniform(km, (N, H, W)) < 0.1
    target = jnp.where(ignore_mask, -1, target)

    px_ref = _reference_pixels(x, target, 2.0, -1)
    ref_sum = jnp.sum(px_ref)
    ref_mean = ref_sum / jnp.sum(target != -1)

    out_mean = jax.block_until_ready(softmax_focal_loss(x, target, reduction="mean"))
    out_sum = jax.block_until_ready(softmax_focal_loss(x, target, reduction="sum"))
    out_none = jax.block_until_ready(softmax_focal_loss(x, target, reduction="none"))

    # Tolerance covers the Newton-refined approximate EUP reciprocal for p_t.
    assert jnp.allclose(out_mean, ref_mean, rtol=5e-4, atol=1e-6), (out_mean, ref_mean)
    assert jnp.allclose(out_sum, ref_sum, rtol=5e-4, atol=1e-6), (out_sum, ref_sum)
    assert jnp.allclose(out_none, px_ref, rtol=5e-4, atol=1e-6)

    # Multi-tile config (forced tile=128 -> 3 lane tiles): exercises the
    # lane-split reduce path including the clamped/masked redundant tile.
    N2, C2, H2, W2 = 1, 5, 16, 24
    x2 = jax.random.uniform(kx, (N2, C2, H2, W2), dtype=jnp.float32)
    t2 = jax.random.randint(kt, (N2, H2, W2), 0, C2, dtype=jnp.int32)
    t2 = jnp.where(jax.random.uniform(km, (N2, H2, W2)) < 0.1, -1, t2)
    px2 = _reference_pixels(x2, t2, 2.0, -1)
    ref_mean2 = jnp.sum(px2) / jnp.sum(t2 != -1)
    out_mean2 = jax.block_until_ready(
        softmax_focal_loss(x2, t2, reduction="mean", max_tile=128))
    out_none2 = jax.block_until_ready(
        softmax_focal_loss(x2, t2, reduction="none", max_tile=128))
    assert jnp.allclose(out_mean2, ref_mean2, rtol=5e-4, atol=1e-6), (out_mean2, ref_mean2)
    assert jnp.allclose(out_none2, px2, rtol=5e-4, atol=1e-6)

    # Ragged spatial extent (H*W = 100 < 128): no HBM pad, in-kernel mask only.
    N3, C3, H3, W3 = 2, 3, 10, 10
    x3_ = jax.random.uniform(kx, (N3, C3, H3, W3), dtype=jnp.float32)
    t3_ = jax.random.randint(kt, (N3, H3, W3), 0, C3, dtype=jnp.int32)
    px3 = _reference_pixels(x3_, t3_, 2.0, -1)
    ref_mean3 = jnp.sum(px3) / jnp.sum(t3_ != -1)
    out_mean3 = jax.block_until_ready(softmax_focal_loss(x3_, t3_, reduction="mean"))
    assert jnp.allclose(out_mean3, ref_mean3, rtol=5e-4, atol=1e-6), (out_mean3, ref_mean3)

    print("KERNEL_OK")
</pallas_src>

<mosaic_0001>
module attributes {stable_mosaic.version = 11 : i64} {
  func.func @_focal_reduce_kernel(%arg0: i32, %arg1: i32, %arg2: i32, %arg3: memref<1x4x256xf32, #tpu.memory_space<vmem>>, %arg4: memref<1x1x256xi32, #tpu.memory_space<vmem>>, %arg5: memref<1x1x1x128xf32, #tpu.memory_space<vmem>>, %arg6: memref<1x1x1x128xf32, #tpu.memory_space<vmem>>, %arg7: memref<1x256xf32, #tpu.memory_space<vmem>>, %arg8: memref<1x256xf32, #tpu.memory_space<vmem>>) attributes {dimension_semantics = [#tpu.dimension_semantics<parallel>, #tpu.dimension_semantics<parallel>, #tpu.dimension_semantics<arbitrary>], iteration_bounds = array<i64: 1, 2, 1>, scalar_prefetch = 0 : i64, scratch_operands = 2 : i64, tpu.core_type = #tpu.core_type<tc>, window_params = [{transform_indices = @transform_0, window_bounds = array<i64: 1, 4, 256>}, {transform_indices = @transform_1, window_bounds = array<i64: 1, 1, 256>}, {transform_indices = @transform_2, window_bounds = array<i64: 1, 1, 1, 128>}, {transform_indices = @transform_3, window_bounds = array<i64: 1, 1, 1, 128>}]} {
    %c0_i32 = arith.constant 0 : i32
    %0 = arith.cmpi eq, %arg2, %c0_i32 : i32
    %1 = arith.extui %0 : i1 to i32
    %c0_i32_0 = arith.constant 0 : i32
    %2 = arith.cmpi ne, %1, %c0_i32_0 : i32
    scf.if %2 {
      %cst_27 = arith.constant 0.000000e+00 : f32
      %66 = vector.broadcast %cst_27 : f32 to vector<1x256xf32>
      %c0_28 = arith.constant 0 : index
      %c0_29 = arith.constant 0 : index
      %67 = vector.load %arg7[%c0_28, %c0_29] : memref<1x256xf32, #tpu.memory_space<vmem>>, vector<1x256xf32>
      tpu.vector_store %arg7[%c0_28, %c0_29], %66 {strides = array<i32>} : memref<1x256xf32, #tpu.memory_space<vmem>>, vector<1x256xf32>,
      %cst_30 = arith.constant 0.000000e+00 : f32
      %68 = vector.broadcast %cst_30 : f32 to vector<1x256xf32>
      %c0_31 = arith.constant 0 : index
      %c0_32 = arith.constant 0 : index
      %69 = vector.load %arg8[%c0_31, %c0_32] : memref<1x256xf32, #tpu.memory_space<vmem>>, vector<1x256xf32>
      tpu.vector_store %arg8[%c0_31, %c0_32], %68 {strides = array<i32>} : memref<1x256xf32, #tpu.memory_space<vmem>>, vector<1x256xf32>,
    } else {
    }
    %c0 = arith.constant 0 : index
    %c0_1 = arith.constant 0 : index
    %c0_2 = arith.constant 0 : index
    %3 = vector.load %arg3[%c0, %c0_1, %c0_2] : memref<1x4x256xf32, #tpu.memory_space<vmem>>, vector<1x4x256xf32>
    %4 = vector.shape_cast %3 : vector<1x4x256xf32> to vector<4x256xf32>
    %c0_3 = arith.constant 0 : index
    %c0_4 = arith.constant 0 : index
    %c0_5 = arith.constant 0 : index
    %5 = vector.load %arg4[%c0_3, %c0_4, %c0_5] : memref<1x1x256xi32, #tpu.memory_space<vmem>>, vector<1x1x256xi32>
    %6 = vector.shape_cast %5 : vector<1x1x256xi32> to vector<1x256xi32>
    %c1_i32 = arith.constant 1 : i32
    %7 = arith.muli %arg0, %c1_i32 : i32
    %8 = arith.addi %7, %arg2 : i32
    %9 = tpu.iota {dimensions = array<i32: 1>} : vector<1x256xi32>
    %c256_i32 = arith.constant 256 : i32
    %10 = arith.muli %8, %c256_i32 : i32
    %11 = vector.broadcast %10 : i32 to vector<1x256xi32>
    %12 = arith.addi %11, %9 : vector<1x256xi32>
    %c256_i32_6 = arith.constant 256 : i32
    %13 = vector.broadcast %c256_i32_6 : i32 to vector<1x256xi32>
    %14 = arith.cmpi slt, %12, %13 : vector<1x256xi32>
    %c-1_i32 = arith.constant -1 : i32
    %15 = vector.broadcast %c-1_i32 : i32 to vector<1x256xi32>
    %16 = arith.cmpi ne, %6, %15 : vector<1x256xi32>
    %17 = arith.andi %14, %16 : vector<1x256xi1>
    %c0_i32_7 = arith.constant 0 : i32
    %18 = vector.broadcast %c0_i32_7 : i32 to vector<1x256xi32>
    %19 = arith.select %17, %6, %18 : vector<1x256xi1>, vector<1x256xi32>
    %20 = tpu.iota {dimensions = array<i32: 0>} : vector<4x256xi32>
    %21 = vector.broadcast %19 : vector<1x256xi32> to vector<4x256xi32>
    %22 = arith.cmpi eq, %20, %21 : vector<4x256xi32>
    %cst = arith.constant dense<0xFF800000> : vector<256xf32>
    %23 = vector.multi_reduction <maximumf>, %4, %cst [0] : vector<4x256xf32> to vector<256xf32>
    %24 = vector.shape_cast %23 : vector<256xf32> to vector<1x256xf32>
    %cst_8 = arith.constant 0.000000e+00 : f32
    %25 = vector.broadcast %cst_8 : f32 to vector<4x256xf32>
    %26 = arith.select %22, %4, %25 : vector<4x256xi1>, vector<4x256xf32>
    %cst_9 = arith.constant dense<0.000000e+00> : vector<256xf32>
    %27 = vector.multi_reduction <add>, %26, %cst_9 [0] : vector<4x256xf32> to vector<256xf32>
    %28 = vector.shape_cast %27 : vector<256xf32> to vector<1x256xf32>
    %29 = vector.broadcast %24 : vector<1x256xf32> to vector<4x256xf32>
    %30 = arith.subf %4, %29 : vector<4x256xf32>
    %31 = math.exp %30 : vector<4x256xf32>
    %cst_10 = arith.constant dense<0.000000e+00> : vector<256xf32>
    %32 = vector.multi_reduction <add>, %31, %cst_10 [0] : vector<4x256xf32> to vector<256xf32>
    %33 = vector.shape_cast %32 : vector<256xf32> to vector<1x256xf32>
    %cst_11 = arith.constant 0.000000e+00 : f32
    %34 = vector.broadcast %cst_11 : f32 to vector<4x256xf32>
    %35 = arith.select %22, %31, %34 : vector<4x256xi1>, vector<4x256xf32>
    %cst_12 = arith.constant dense<0.000000e+00> : vector<256xf32>
    %36 = vector.multi_reduction <add>, %35, %cst_12 [0] : vector<4x256xf32> to vector<256xf32>
    %37 = vector.shape_cast %36 : vector<256xf32> to vector<1x256xf32>
    %38 = arith.subf %28, %24 : vector<1x256xf32>
    %39 = tpu.reciprocal %33 {approx = true} : vector<1x256xf32> -> vector<1x256xf32>
    %40 = arith.mulf %33, %39 : vector<1x256xf32>
    %cst_13 = arith.constant 2.000000e+00 : f32
    %41 = vector.broadcast %cst_13 : f32 to vector<1x256xf32>
    %42 = arith.subf %41, %40 : vector<1x256xf32>
    %43 = arith.mulf %39, %42 : vector<1x256xf32>
    %44 = arith.mulf %37, %43 : vector<1x256xf32>
    %45 = math.log %33 : vector<1x256xf32>
    %46 = arith.subf %45, %38 : vector<1x256xf32>
    %cst_14 = arith.constant 1.000000e+00 : f32
    %47 = vector.broadcast %cst_14 : f32 to vector<1x256xf32>
    %48 = arith.subf %47, %44 : vector<1x256xf32>
    %cst_15 = arith.constant 1.000000e+00 : f32
    %49 = vector.broadcast %cst_15 : f32 to vector<1x256xf32>
    %50 = arith.mulf %49, %48 : vector<1x256xf32>
    %51 = arith.mulf %50, %48 : vector<1x256xf32>
    %52 = arith.mulf %51, %46 : vector<1x256xf32>
    %cst_16 = arith.constant 0.000000e+00 : f32
    %53 = vector.broadcast %cst_16 : f32 to vector<1x256xf32>
    %54 = arith.select %17, %52, %53 : vector<1x256xi1>, vector<1x256xf32>
    %c0_17 = arith.constant 0 : index
    %c0_18 = arith.constant 0 : index
    %55 = vector.load %arg7[%c0_17, %c0_18] : memref<1x256xf32, #tpu.memory_space<vmem>>, vector<1x256xf32>
    %56 = arith.addf %55, %54 : vector<1x256xf32>
    %c0_19 = arith.constant 0 : index
    %c0_20 = arith.constant 0 : index
    %57 = vector.load %arg7[%c0_19, %c0_20] : memref<1x256xf32, #tpu.memory_space<vmem>>, vector<1x256xf32>
    tpu.vector_store %arg7[%c0_19, %c0_20], %56 {strides = array<i32>} : memref<1x256xf32, #tpu.memory_space<vmem>>, vector<1x256xf32>,
    %c0_21 = arith.constant 0 : index
    %c0_22 = arith.constant 0 : index
    %58 = vector.load %arg8[%c0_21, %c0_22] : memref<1x256xf32, #tpu.memory_space<vmem>>, vector<1x256xf32>
    %59 = arith.extui %17 : vector<1x256xi1> to vector<1x256xi32>
    %60 = arith.sitofp %59 : vector<1x256xi32> to vector<1x256xf32>
    %61 = arith.addf %58, %60 : vector<1x256xf32>
    %c0_23 = arith.constant 0 : index
    %c0_24 = arith.constant 0 : index
    %62 = vector.load %arg8[%c0_23, %c0_24] : memref<1x256xf32, #tpu.memory_space<vmem>>, vector<1x256xf32>
    tpu.vector_store %arg8[%c0_23, %c0_24], %61 {strides = array<i32>} : memref<1x256xf32, #tpu.memory_space<vmem>>, vector<1x256xf32>,
    %c0_i32_25 = arith.constant 0 : i32
    %63 = arith.cmpi eq, %arg2, %c0_i32_25 : i32
    %64 = arith.extui %63 : i1 to i32
    %c0_i32_26 = arith.constant 0 : i32
    %65 = arith.cmpi ne, %64, %c0_i32_26 : i32
    scf.if %65 {
      %c0_27 = arith.constant 0 : index
      %c0_28 = arith.constant 0 : index
      %66 = vector.load %arg7[%c0_27, %c0_28] : memref<1x256xf32, #tpu.memory_space<vmem>>, vector<1x256xf32>
      %67 = vector.shape_cast %66 : vector<1x256xf32> to vector<1x1x256xf32>
      %cst_29 = arith.constant dense<0.000000e+00> : vector<1xf32>
      %68 = vector.multi_reduction <add>, %67, %cst_29 [1, 2] : vector<1x1x256xf32> to vector<1xf32>
      %69 = vector.shape_cast %68 : vector<1xf32> to vector<1x1x1xf32>
      %70 = vector.extract %69[0, 0, 0] : f32 from vector<1x1x1xf32>
      %71 = vector.broadcast %70 : f32 to vector<1x1x1x128xf32>
      %c0_30 = arith.constant 0 : index
      %c0_31 = arith.constant 0 : index
      %c0_32 = arith.constant 0 : index
      %c0_33 = arith.constant 0 : index
      %72 = vector.load %arg5[%c0_30, %c0_31, %c0_32, %c0_33] : memref<1x1x1x128xf32, #tpu.memory_space<vmem>>, vector<1x1x1x128xf32>
      tpu.vector_store %arg5[%c0_30, %c0_31, %c0_32, %c0_33], %71 {strides = array<i32>} : memref<1x1x1x128xf32, #tpu.memory_space<vmem>>, vector<1x1x1x128xf32>,
      %c0_34 = arith.constant 0 : index
      %c0_35 = arith.constant 0 : index
      %73 = vector.load %arg8[%c0_34, %c0_35] : memref<1x256xf32, #tpu.memory_space<vmem>>, vector<1x256xf32>
      %74 = vector.shape_cast %73 : vector<1x256xf32> to vector<1x1x256xf32>
      %cst_36 = arith.constant dense<0.000000e+00> : vector<1xf32>
      %75 = vector.multi_reduction <add>, %74, %cst_36 [1, 2] : vector<1x1x256xf32> to vector<1xf32>
      %76 = vector.shape_cast %75 : vector<1xf32> to vector<1x1x1xf32>
      %77 = vector.extract %76[0, 0, 0] : f32 from vector<1x1x1xf32>
      %78 = vector.broadcast %77 : f32 to vector<1x1x1x128xf32>
      %c0_37 = arith.constant 0 : index
      %c0_38 = arith.constant 0 : index
      %c0_39 = arith.constant 0 : index
      %c0_40 = arith.constant 0 : index
      %79 = vector.load %arg6[%c0_37, %c0_38, %c0_39, %c0_40] : memref<1x1x1x128xf32, #tpu.memory_space<vmem>>, vector<1x1x1x128xf32>
      tpu.vector_store %arg6[%c0_37, %c0_38, %c0_39, %c0_40], %78 {strides = array<i32>} : memref<1x1x1x128xf32, #tpu.memory_space<vmem>>, vector<1x1x1x128xf32>,
    } else {
    }
    return
  }
  func.func @transform_0(%arg0: i32, %arg1: i32, %arg2: i32) -> (i32, i32, i32) {
    %c1_i32 = arith.constant 1 : i32
    %0 = arith.muli %arg0, %c1_i32 : i32
    %1 = arith.addi %0, %arg2 : i32
    %c0_i32 = arith.constant 0 : i32
    %2 = arith.minsi %1, %c0_i32 : i32
    %c0_i32_0 = arith.constant 0 : i32
    %c0_i32_1 = arith.constant 0 : i32
    return %arg1, %c0_i32_0, %2 : i32, i32, i32
  }
  func.func @transform_1(%arg0: i32, %arg1: i32, %arg2: i32) -> (i32, i32, i32) {
    %c1_i32 = arith.constant 1 : i32
    %0 = arith.muli %arg0, %c1_i32 : i32
    %1 = arith.addi %0, %arg2 : i32
    %c0_i32 = arith.constant 0 : i32
    %2 = arith.minsi %1, %c0_i32 : i32
    %c0_i32_0 = arith.constant 0 : i32
    %c0_i32_1 = arith.constant 0 : i32
    return %arg1, %c0_i32_0, %2 : i32, i32, i32
  }
  func.func @transform_2(%arg0: i32, %arg1: i32, %arg2: i32) -> (i32, i32, i32, i32) {
    %c0_i32 = arith.constant 0 : i32
    %c0_i32_0 = arith.constant 0 : i32
    %c0_i32_1 = arith.constant 0 : i32
    return %arg0, %arg1, %c0_i32, %c0_i32_0 : i32, i32, i32, i32
  }
  func.func @transform_3(%arg0: i32, %arg1: i32, %arg2: i32) -> (i32, i32, i32, i32) {
    %c0_i32 = arith.constant 0 : i32
    %c0_i32_0 = arith.constant 0 : i32
    %c0_i32_1 = arith.constant 0 : i32
    return %arg0, %arg1, %c0_i32, %c0_i32_0 : i32, i32, i32, i32
  }
}

</mosaic_0001>

<bundles_post_ra>
// kernel: tpu_custom_call.1
= control target key start
LH: loop header
LB: loop body
LE: loop exit
PB: predicated region body
PF: predicated region fallthrough
CT: control target
= control target key end

     0   :  { %9 = vsyncpa [#allocation5], 0  ;;  %s1383_s0 = inlined_call_operand.hbm [shape: f32[2,4,256], index: 0, kind: input, shape index: {}]   ;;  %s1384_s1 = inlined_call_operand.hbm [shape: s32[2,1,256], index: 1, kind: input, shape index: {}]   ;;  %s1385_s2 = inlined_call_operand.hbm [shape: f32[1,2,1,128], index: 2, kind: output, shape index: {0}]   ;;  %s1386_s3 = inlined_call_operand.hbm [shape: f32[1,2,1,128], index: 3, kind: output, shape index: {1}]  }
   0x1   :  { %11 = vsyncpa [#allocation5 + $0x1], 0 }
   0x2   :  { %12 = vsyncpa [#allocation8], 0 }
   0x3   :  { %14 = vsyncpa [#allocation8 + $0x1], 0 }
   0x4   :  { %15 = vsyncpa [#allocation6], 0 }
   0x5   :  { %17 = vsyncpa [#allocation6 + $0x1], 0 }
   0x6   :  { %18 = vsyncpa [#allocation11], 0 }
   0x7   :  { %20 = vsyncpa [#allocation11 + $0x1], 0  ;;  %s1045_s12 = smov 0   ;;  %s1047_s13 = smov 0  }
   0x8   :  { %s1049_s14 = smov 0   ;;  %s1051_s15 = smov 0  }
   0x9   :  { %s1053_s16 = smov 0   ;;  %s1055_s17 = smov 0  }
   0xa LB: > { %s727_s18 = sadd.s32 4294967295, %s1016_s17   ;;  %s728_s19 = sadd.s32 4294967294, %s1016_s17   ;;  %s1016_s17 = sphi %s1055_s17, %s26_s17   ;;  %s1012_s16 = sphi %s1053_s16, %s1416_s16   ;;  %s1008_s15 = sphi %s1051_s15, %s1415_s15   ;;  %s1004_s14 = sphi %s1049_s14, %s1414_s14   ;;  %s1000_s13 = sphi %s1047_s13, %s1413_s13   ;;  %s996_s12 = sphi %s1045_s12, %s1412_s12  }
   0xb   : > { %s41_s20 = sadd.s32 1, %s1012_s16  ;;  %s60_s21 = sadd.s32 1, %s1004_s14 }
   0xc   : > { %p43_p0 = scmp.ge.s32.totalorder %s41_s20, 2  ;;  %p67_p1 = scmp.ne.s32.totalorder %s1004_s14, %s1000_s13 }
   0xd   : > { %p68_p2 = scmp.eq.s32.totalorder %s1016_s17, 0  ;;  %p73_p3 = scmp.ne.s32.totalorder %s1000_s13, %s996_s12 }
   0xe   : > { %s1418_s20 = smov (%p43_p0, %s41_s20), 0  ;;  %p74_p5 = scmp.eq.s32.totalorder %s727_s18, 0 }
   0xf   : > { %p1086_p4 = por %p68_p2, %p67_p1  ;;  %s55_s23 = ssub.s32 %s1012_s16, %s1418_s20 }
  0x10   : > { %p133_p6 = scmp.eq.s32.totalorder %s727_s18, 1  ;;  %p58_p7 = scmp.eq.s32.totalorder %s55_s23, 0 }
  0x11   : > { %p1092_p8 = por %p74_p5, %p73_p3  ;;  %p139_p10 = scmp.eq.s32.totalorder %s728_s19, 1 }
  0x12   : > { %p1096_p9 = por %p133_p6, %p67_p1  ;;  %p774_p13 = scmp.lt.s32.totalorder %s1016_s17, 2 }
  0x13   : > { %s1390_s24 = scalar_select %p1092_p8, 1, 0 }
  0x14   : > { %s1391_s25 = scalar_select %p1096_p9, 1, 0 }
  0x15   : > { %s1101_s26 = scalar_select %p58_p7, %s1004_s14, %s60_s21  }
  0x16   : > { %p1103_p11 = por %p139_p10, %p73_p3  ;;  %s1110_s28 = sand.u32 1, %s1004_s14  }
  0x17   : > { %s731_s29 = sshll.u32 %s1110_s28, 3  ;;  %s746_s30 = sshll.u32 %s1012_s16, 7 }
  0x18   : > { %s1392_s27 = scalar_select %p1103_p11, 1, 0 }
  0x19   : > { %s1117_s6 = scalar_lea.hbm %s1383_s0, %s746_s30  ;;  %s191_s7 = scalar_lea.vmem [#allocation4], %s731_s29 }
  0x1a   : > { %s204_s8 = sshll.u32 %s191_s7, 4  ;;  %p1123_p0 = pnand %p774_p13, %p1086_p4  ;;  %s1119_s8 = int_to_ptr.vmem [resolvable:$true] %s204_s8 }
  0x1b   : > { %s188_s10 = scalar_lea.sflag [#allocation5], %s1110_s28  ;;  %s838_s11 = scalar_lea.hbm %s1117_s6, 128 }
  0x1c   : > { %p839_p3 = scmp.ne.s32.totalorder %s1117_s6, %s838_s11  ;;  %p840_p5 = pneg %p1123_p0 }
  0x1d   : > { %s843_s21 = scalar_lea.hbm %s1383_s0, 256  ;;  %p844_p4 = scmp.lt.u32.totalorder %s1117_s6, %s1383_s0 }
  0x1e   : > { %p841_p6 = pnand %p840_p5, %p839_p3  ;;  %p845_p10 = scmp.lt.u32.totalorder %s843_s21, %s838_s11 }
  0x1f   : > { %p847_p12 = scmp.lt.u32.totalorder %s838_s11, %s1117_s6 }
  0x20   : > { %p842_p7 = pneg %p841_p6  ;;  %p846_p13 = por %p845_p10, %p844_p4 }
  0x22   : > { %p848_p1 = por %p847_p12, %p846_p13 }
  0x24   : > { %p849_p2 = pnand %p848_p1, %p842_p7 }
  0x26   : > { %852 = shalt.err (!%p849_p2)
}
  0x27   : > { %s853_s29 = scalar_lea.vmem %s1119_s8, 128  ;;  %s1018_s30 = smov [#allocation4]  }
  0x28   : > { %p854_p3 = scmp.ne.s32.totalorder %s1119_s8, %s853_s29  ;;  %s858_s4 = sshll.u32 %s1018_s30, 4  ;;  %s859_s4 = int_to_ptr.vmem [resolvable:$false] %s858_s4 }
  0x29   : > { %s860_s5 = scalar_lea.vmem %s859_s4, 256  ;;  %p861_p9 = scmp.lt.s32.totalorder %s1119_s8, %s859_s4 }
  0x2a   : > { %p856_p6 = pnand %p854_p3, %p840_p5  ;;  %p862_p4 = scmp.lt.s32.totalorder %s860_s5, %s853_s29 }
  0x2c   : > { %p857_p11 = pneg %p856_p6  ;;  %p863_p10 = por %p862_p4, %p861_p9 }
  0x2e   : > { %p864_p12 = pnand %p863_p10, %p857_p11 }
  0x30   : > { %867 = shalt.err (!%p864_p12)
}
  0x31   : > { %763 = dma.hbm_to_vmem [thread:$0]  (!%p1123_p0), %s1117_s6, 128, %s1119_s8, %s188_s10  }
  0x32   : > { %p1394_p1 = scmp.lt.s32.totalorder %s1016_s17, 3  ;;  %p1395_p2 = scmp.ge.s32.totalorder %s1016_s17, 1 }
  0x33   : > { %s734_s11 = sshll.u32 %s1110_s28, 1  ;;  %s747_s18 = sshll.u32 %s1012_s16, 5 }
  0x34   : > { %p1159_p7 = pnand %p1395_p2, %p1394_p1  ;;  %s1168_s22 = scalar_lea.hbm %s1384_s1, %s747_s18 }
  0x35   : > { %s215_s23 = scalar_lea.vmem [#allocation7], %s734_s11  ;;  %s212_s6 = scalar_lea.sflag [#allocation8], %s1110_s28 }
  0x36   : > { %s1396_s7 = scalar_select %p1159_p7, 1, 0 }
  0x37   : > { %s228_s29 = sshll.u32 %s215_s23, 4  ;;  %s868_s8 = scalar_lea.hbm %s1168_s22, 32  ;;  %s229_s29 = int_to_ptr.vmem [resolvable:$true] %s228_s29 }
  0x38   : > { %p869_p9 = scmp.ne.s32.totalorder %s1168_s22, %s868_s8  ;;  %s873_s4 = scalar_lea.hbm %s1384_s1, 64 }
  0x39   : > { %p874_p3 = scmp.lt.u32.totalorder %s1168_s22, %s1384_s1  ;;  %p875_p6 = scmp.lt.u32.totalorder %s873_s4, %s868_s8 }
  0x3a   : > { %p871_p11 = pnand %p869_p9, %p840_p5  ;;  %p877_p10 = scmp.lt.u32.totalorder %s868_s8, %s1168_s22 }
  0x3b   : > { %p876_p4 = por %p875_p6, %p874_p3 }
  0x3c   : > { %p872_p13 = pneg %p871_p11 }
  0x3d   : > { %p878_p12 = por %p877_p10, %p876_p4 }
  0x3f   : > { %p879_p1 = pnand %p878_p12, %p872_p13 }
  0x41   : > { %882 = shalt.err (!%p879_p1)
}
  0x42   : > { %s883_s28 = scalar_lea.vmem %s229_s29, 32  ;;  %s1019_s11 = smov [#allocation7]  }
  0x43   : > { %p884_p2 = scmp.ne.s32.totalorder %s229_s29, %s883_s28  ;;  %s888_s19 = sshll.u32 %s1019_s11, 4  ;;  %s889_s19 = int_to_ptr.vmem [resolvable:$false] %s888_s19 }
  0x44   : > { %s890_s21 = scalar_lea.vmem %s889_s19, 64  ;;  %p891_p8 = scmp.lt.s32.totalorder %s229_s29, %s889_s19 }
  0x45   : > { %p886_p9 = pnand %p884_p2, %p840_p5  ;;  %p892_p7 = scmp.lt.s32.totalorder %s890_s21, %s883_s28 }
  0x47   : > { %p887_p11 = pneg %p886_p9  ;;  %p893_p3 = por %p892_p7, %p891_p8 }
  0x49   : > { %p894_p6 = pnand %p893_p3, %p887_p11 }
  0x4b   : > { %897 = shalt.err (!%p894_p6)
}
  0x4c   : > { %766 = dma.hbm_to_vmem [thread:$0]  (!%p1123_p0), %s1168_s22, 32, %s229_s29, %s212_s6  }
  0x4d   : > { %p1397_p13 = scmp.ne.s32.totalorder %s1396_s7, 0 }
  0x4e   : > { %s1193_s23 = sand.u32 (!%p1397_p13), 1, %s1000_s13   ;;  %p1398_p5 = scmp.ne.s32.totalorder (!%p1397_p13), %s1390_s24, 0 }
  0x4f   : > { %237 = sbr.rel (%p1397_p13) target bundleno = 428 (0x1ac), region = 28  ;;  %s738_s8 = sshll.u32 (!%p1397_p13), %s1193_s23, 3 }
  0x50   : > { %s240_s10 = scalar_lea.sflag (!%p1397_p13), [#allocation5], %s1193_s23  ;;  %s243_s30 = scalar_lea.vmem (!%p1397_p13), [#allocation4], %s738_s8 }
  0x56   : > { %979 = dma.done.wait (%p1398_p5), %s240_s10, 128  }
  0x57   : > { %981 = vsyncadd (%p1398_p5), %s240_s10, 4294967168  ;;  %s739_s9 = sshll.u32 %s1193_s23, 1  ;;  %s249_s7 = scalar_lea.sflag [#allocation8], %s1193_s23 }
  0x58   : > { %s252_s22 = scalar_lea.vmem [#allocation7], %s739_s9 }
  0x59   : > { %983 = dma.done.wait (%p1398_p5), %s249_s7, 32  }
  0x5a   : > { %985 = vsyncadd (%p1398_p5), %s249_s7, 4294967264  ;;  %v295_v0 = vlaneseq  ;;  %v1020_v3 = vmov 0.0   ;;  %vm352_vm1 = vcmask 1043456   ;;  %v301_v6 = vld [vmem:[%s243_s30] sm:$0xff]  ;;  %v302_v7 = vld [vmem:[%s252_s22] sm:$0x3] }
  0x5b   : > { %v1021_v8 = vmov 1966171168   ;;  %vm313_vm2 = vcmp.ne.s32.totalorder %v302_v7, 4294967295  ;;  %v350_v10 = vcombine.high %v301_v6, %v301_v6  ;;  %v1022_v11 = vmov 0   ;;  %s742_s24 = sshll.u32 %s1008_s15, 4  ;;  %s276_s29 = scalar_lea.vmem [#allocation9], %s1193_s23 }
  0x5c   : > { %vm1207_vm0 = vcmp.lt.s32.totalorder %v295_v0, 256  ;;  %v316_v2 = vshrl.u32 %v295_v0, 7  ;;  %v454_v9 = vunpack.c.l.s4 %v1021_v8  ;;  %v314_v12 = vsel %vm313_vm2, 1, %v1022_v11  ;;  %s574_s6 = sshll.u32 %s276_s29, 4  ;;  %s282_s4 = scalar_lea.vmem [#allocation10], %s1193_s23  ;;  %s1303_s6 = int_to_ptr.vmem [resolvable:$true] %s574_s6 }
  0x5d   : > { %299 = vst.msk [vmem:[#allocation2] sm:$0x3] %vm1207_vm0, %v1020_v3  ;;  %300 = vst.msk [vmem:[#allocation3] sm:$0x3] %vm1207_vm0, %v1020_v3  ;;  %v353_v13 = vsel %vm352_vm1, %v301_v6, -inf  ;;  %v360_v17 = vsel %vm352_vm1, %v350_v10, -inf  ;;  %s1301_s11 = scalar_lea.hbm %s1385_s2, %s742_s24 }
  0x5e   : > { %v1215_v4 = vsub.s32 0, %v316_v2  ;;  %v1217_v5 = vsub.s32 1, %v316_v2  ;;  %v354_v16 = vrot.slane %v353_v13, 4  ;;  %v361_v18 = vrot.slane %v360_v17, 4  ;;  %s589_s5 = sshll.u32 %s282_s4, 4  ;;  %s556_s21 = scalar_lea.sflag [#allocation6], %s1193_s23  ;;  %s1305_s5 = int_to_ptr.vmem [resolvable:$true] %s589_s5 }
  0x5f   : > { %v455_v19 = vunpack.c.0.s8 %v454_v9  ;;  %vm514_vm7 = vcmask 1040384   ;;  %s898_s8 = scalar_lea.vmem %s1303_s6, 16  ;;  %p1409_p0 = scmp.ne.s32.totalorder %s1391_s25, 0 }
  0x60   : > { %v318_v14 = vrot.slane %v314_v12, %v1215_v4  ;;  %v322_v15 = vrot.slane %v314_v12, %v1217_v5  ;;  %v355_v21 = vmax.f32 %v353_v13, %v354_v16  ;;  %v362_v23 = vmax.f32 %v360_v17, %v361_v18  ;;  %p899_p8 = scmp.ne.s32.totalorder %s1303_s6, %s898_s8  ;;  %s1023_s10 = smov [#allocation9]  }
  0x61   : > { %v1235_v28 = vsub.s32 %v455_v19, %v316_v2  ;;  %v330_v41 = vrot.slane %v302_v7, %v1215_v4  ;;  %v334_v43 = vrot.slane %v302_v7, %v1217_v5  ;;  %s902_s30 = sshll.u32 %s1023_s10, 4  ;;  %s903_s30 = int_to_ptr.vmem [resolvable:$false] %s902_s30 }
  0x62   : > { %vm1223_vm3 = vcmp.ne.s32.totalorder %v318_v14, 0  ;;  %vm1227_vm4 = vcmp.ne.s32.totalorder %v322_v15, 0  ;;  %v356_v25 = vrot.slane %v355_v21, 2  ;;  %v363_v27 = vrot.slane %v362_v23, 2  ;;  %p900_p7 = pnand %p899_p8, %p1409_p0  ;;  %s904_s9 = scalar_lea.vmem %s903_s30, 32 }
  0x63   : > { %v740_v24 = vsel %vm1223_vm3, 1.0, %v1020_v3  ;;  %v741_v26 = vsel %vm1227_vm4, 1.0, %v1020_v3  ;;  %v335_v45 = vsel %vm1223_vm3, %v330_v41, 0  ;;  %v336_v46 = vsel %vm1227_vm4, %v334_v43, 0  ;;  %p905_p10 = scmp.lt.s32.totalorder %s1303_s6, %s903_s30  ;;  %p906_p12 = scmp.lt.s32.totalorder %s904_s9, %s898_s8 }
  0x64   : > { %v481_v29 = vcombine.low %v740_v24, %v741_v26  ;;  %v357_v30 = vmax.f32 %v355_v21, %v356_v25  ;;  %v364_v31 = vmax.f32 %v362_v23, %v363_v27  ;;  %v474_v34 = vld [vmem:[#allocation3] sm:$0x3]  ;;  %v342_v47 = vrot.slane %v335_v45, %v1215_v4  ;;  %p901_p4 = pneg %p900_p7 }
  0x65   : > { %v346_v48 = vrot.slane %v336_v46, %v1215_v4  ;;  %p907_p1 = por %p906_p12, %p905_p10 }
  0x66   : > { %v488_v32 = vrot.slane %v481_v29, %v1235_v28  ;;  %v358_v33 = vrot.slane %v357_v30, 1  ;;  %v365_v35 = vrot.slane %v364_v31, 1  ;;  %vm1255_vm5 = vcmp.eq.s32.totalorder %v316_v2, %v342_v47 }
  0x67   : > { %v367_v50 = vsel %vm1255_vm5, %v301_v6, 0.0  ;;  %vm1261_vm6 = vcmp.eq.s32.totalorder %v316_v2, %v346_v48  ;;  %p908_p2 = pnand %p907_p1, %p901_p4 }
  0x68   : > { %v495_v36 = vrot.slane %v488_v32, %v1235_v28  ;;  %v1239_v37 = vmax.f32 %v357_v30, %v358_v33  ;;  %v1241_v38 = vmax.f32 %v364_v31, %v365_v35  ;;  %v368_v53 = vsel %vm1261_vm6, %v350_v10, 0.0 }
  0x69   : > { %v369_v54 = vsel %vm352_vm1, %v367_v50, 0.0  ;;  %v376_v59 = vsel %vm352_vm1, %v368_v53, 0.0 }
  0x6a   : > { %v497_v39 = vadd.f32 %v495_v36, %v474_v34  ;;  %v385_v40 = vcombine.low %v1239_v37, %v1241_v38  ;;  %v370_v62 = vrot.slane %v369_v54, 4  ;;  %v377_v8 = vrot.slane %v376_v59, 4 }
  0x6c   : > { %498 = vst.msk [vmem:[#allocation3] sm:$0x3] %vm1207_vm0, %v497_v39  ;;  %v387_v42 = vsub.f32 %v301_v6, %v385_v40  ;;  %v371_v10 = vadd.f32 %v370_v62, %v369_v54  ;;  %v378_v16 = vadd.f32 %v377_v8, %v376_v59  ;;  %v449_v8 = vld [vmem:[#allocation2] sm:$0x3] }
  0x6e   : > { %v388_v44 = vmul.f32 1.442695, %v387_v42  ;;  %v372_v18 = vrot.slane %v371_v10, 2  ;;  %v379_v25 = vrot.slane %v378_v16, 2 }
  0x70   : > { %828 = vpow2.f32 %v388_v44  ;;  %v373_v27 = vadd.f32 %v372_v18, %v371_v10  ;;  %v380_v30 = vadd.f32 %v379_v25, %v378_v16 }
  0x72   : > { %v374_v32 = vrot.slane %v373_v27, 1  ;;  %v381_v34 = vrot.slane %v380_v30, 1 }
  0x74   : > { %v375_v39 = vadd.f32 %v374_v32, %v373_v27  ;;  %v382_v44 = vadd.f32 %v381_v34, %v380_v30 }
  0x76   : > { %v423_v49 = vsub.f32 %v375_v39, %v1239_v37  ;;  %v424_v54 = vsub.f32 %v382_v44, %v1241_v38 }
  0x7a   : > { %v829_v52 = vpop.eup %828 }
  0x7b   : > { %v391_v55 = vcombine.high %v829_v52, %v829_v52  ;;  %v393_v56 = vsel %vm352_vm1, %v829_v52, 0.0  ;;  %v407_v57 = vsel %vm1255_vm5, %v829_v52, 0.0 }
  0x7c   : > { %v394_v58 = vrot.slane %v393_v56, 4  ;;  %v409_v2 = vsel %vm352_vm1, %v407_v57, 0.0 }
  0x7d   : > { %v400_v60 = vsel %vm352_vm1, %v391_v55, 0.0  ;;  %v408_v61 = vsel %vm1261_vm6, %v391_v55, 0.0  ;;  %v410_v9 = vrot.slane %v409_v2, 4 }
  0x7e   : > { %v395_v63 = vadd.f32 %v394_v58, %v393_v56  ;;  %v401_v0 = vrot.slane %v400_v60, 4  ;;  %v416_v7 = vsel %vm352_vm1, %v408_v61, 0.0 }
  0x7f   : > { %v417_v13 = vrot.slane %v416_v7, 4  ;;  %v411_v17 = vadd.f32 %v410_v9, %v409_v2 }
  0x80   : > { %v396_v3 = vrot.slane %v395_v63, 2  ;;  %v402_v6 = vadd.f32 %v401_v0, %v400_v60 }
  0x81   : > { %v418_v23 = vadd.f32 %v417_v13, %v416_v7  ;;  %v412_v26 = vrot.slane %v411_v17, 2 }
  0x82   : > { %v397_v11 = vadd.f32 %v396_v3, %v395_v63  ;;  %v403_v12 = vrot.slane %v402_v6, 2 }
  0x83   : > { %v419_v29 = vrot.slane %v418_v23, 2  ;;  %v413_v31 = vadd.f32 %v412_v26, %v411_v17 }
  0x84   : > { %v398_v14 = vrot.slane %v397_v11, 1  ;;  %v404_v15 = vadd.f32 %v403_v12, %v402_v6 }
  0x85   : > { %v420_v33 = vadd.f32 %v419_v29, %v418_v23  ;;  %v414_v35 = vrot.slane %v413_v31, 1 }
  0x86   : > { %v399_v19 = vadd.f32 %v398_v14, %v397_v11  ;;  %v405_v21 = vrot.slane %v404_v15, 1  ;;  %v529_v11 = vld [vmem:[#allocation3] sm:$0x3] }
  0x87   : > { %v421_v41 = vrot.slane %v420_v33, 1  ;;  %v415_v45 = vadd.f32 %v414_v35, %v413_v31  ;;  %v534_v12 = vrot.slane %v529_v11, %v1215_v4  ;;  %v538_v13 = vrot.slane %v529_v11, %v1217_v5 }
  0x88   : > { %v406_v24 = vadd.f32 %v405_v21, %v404_v15  ;;  %830 = vrcp.f32 %v399_v19 }
  0x89   : > { %832 = vlog2.f32 %v399_v19  ;;  %v422_v50 = vadd.f32 %v421_v41, %v420_v33  ;;  %v541_v17 = vsel %vm514_vm7, %v534_v12, 0.0  ;;  %v542_v18 = vsel %vm514_vm7, %v538_v13, 0.0 }
  0x8a   : > { %834 = vrcp.f32 %v406_v24 }
  0x8b   : > { %836 = vlog2.f32 %v406_v24 }
  0x92   : > { %v831_v36 = vpop.eup %830 }
  0x93   : > { %v833_v40 = vpop.eup %832  ;;  %v427_v42 = vmul.f32 %v831_v36, %v399_v19  ;;  %v543_v19 = vadd.f32 %v542_v18, %v541_v17 }
  0x94   : > { %v835_v43 = vpop.eup %834  ;;  %v436_v53 = vmul.f32 0.6931472, %v833_v40 }
  0x95   : > { %v428_v46 = vmul.f32 %v835_v43, %v406_v24  ;;  %v429_v47 = vsub.f32 2.0, %v427_v42  ;;  %v837_v48 = vpop.eup %836 }
  0x96   : > { %v438_v57 = vmul.f32 0.6931472, %v837_v48  ;;  %v439_v59 = vsub.f32 %v436_v53, %v423_v49 }
  0x97   : > { %v430_v51 = vsub.f32 2.0, %v428_v46  ;;  %v431_v52 = vmul.f32 %v831_v36, %v429_v47 }
  0x98   : > { %v440_v61 = vsub.f32 %v438_v57, %v424_v54 }
  0x99   : > { %v432_v55 = vmul.f32 %v835_v43, %v430_v51  ;;  %v433_v56 = vmul.f32 %v431_v52, %v415_v45 }
  0x9b   : > { %v434_v58 = vmul.f32 %v432_v55, %v422_v50  ;;  %v441_v60 = vsub.f32 1.0, %v433_v56 }
  0x9d   : > { %v442_v62 = vsub.f32 1.0, %v434_v58  ;;  %v443_v63 = vmul.f32 %v441_v60, %v441_v60 }
  0x9f   : > { %v444_v0 = vmul.f32 %v442_v62, %v442_v62  ;;  %v445_v2 = vmul.f32 %v443_v63, %v439_v59 }
  0xa1   : > { %v446_v3 = vmul.f32 %v444_v0, %v440_v61  ;;  %v447_v37 = vsel %vm1223_vm3, %v445_v2, 0.0 }
  0xa3   : > { %v448_v6 = vsel %vm1227_vm4, %v446_v3, 0.0 }
  0xa4   : > { %v452_v7 = vcombine.low %v447_v37, %v448_v6 }
  0xa6   : > { %v459_v38 = vrot.slane %v452_v7, %v1235_v28 }
  0xa8   : > { %v466_v9 = vrot.slane %v459_v38, %v1235_v28 }
  0xaa   : > { %v468_v10 = vadd.f32 %v466_v9, %v449_v8 }
  0xac   : > { %473 = vst.msk [vmem:[#allocation2] sm:$0x3] %vm1207_vm0, %v468_v10 }
  0xb3   : > { %v502_v20 = vld [vmem:[#allocation2] sm:$0x3] }
  0xb4   : > { %v507_v22 = vrot.slane %v502_v20, %v1215_v4  ;;  %v511_v14 = vrot.slane %v502_v20, %v1217_v5 }
  0xb6   : > { %v515_v15 = vsel %vm514_vm7, %v507_v22, 0.0  ;;  %v516_v16 = vsel %vm514_vm7, %v511_v14, 0.0 }
  0xb7   : > { %v517_v28 = vadd.f32 %v516_v16, %v515_v15 }
  0xb9   : > { %518 = vadd.xlane.f32.xlu0 %v517_v28 }
  0xbd   : > { %544 = vadd.xlane.f32.xlu0 %v543_v19 }
 0x146   : > { %v519_v1 = vpop.xlane.xlu0 %518 }
 0x147   : > { %v520_v21 = vrot.slane %v519_v1, 4 }
 0x149   : > { %v521_v23 = vadd.f32 %v520_v21, %v519_v1 }
 0x14a   : > { %v545_v24 = vpop.xlane.xlu0 %544 }
 0x14b   : > { %v522_v25 = vrot.slane %v521_v23, 2  ;;  %v546_v4 = vrot.slane %v545_v24, 4 }
 0x14d   : > { %v547_v5 = vadd.f32 %v546_v4, %v545_v24  ;;  %v523_v26 = vadd.f32 %v522_v25, %v521_v23 }
 0x14f   : > { %v548_v27 = vrot.slane %v547_v5, 2  ;;  %v524_v29 = vrot.slane %v523_v26, 1 }
 0x151   : > { %v549_v30 = vadd.f32 %v548_v27, %v547_v5  ;;  %v525_v31 = vadd.f32 %v524_v29, %v523_v26 }
 0x153   : > { %748 = vpush %v525_v31  ;;  %v550_v32 = vrot.slane %v549_v30, 1 }
 0x155   : > { %v551_v33 = vadd.f32 %v550_v32, %v549_v30 }
 0x157   : > { %750 = vpush %v551_v33 }
 0x184   : > { %s749_s19 = spop %748 }
 0x185   : > { %v527_v34 = vstv %s749_s19 }
 0x186   : > { %528 = vst [vmem:[%s276_s29] sm:$0x1] %v527_v34 }
 0x187   : > { %911 = shalt.err (!%p908_p2)
}
 0x188   : > { %s912_s7 = scalar_lea.hbm %s1301_s11, 16  ;;  %s916_s18 = scalar_lea.hbm %s1385_s2, 32 }
 0x189   : > { %p913_p9 = scmp.ne.s32.totalorder %s1301_s11, %s912_s7  ;;  %p917_p6 = scmp.lt.u32.totalorder %s1301_s11, %s1385_s2 }
 0x18a   : > { %p918_p13 = scmp.lt.u32.totalorder %s916_s18, %s912_s7  ;;  %p920_p8 = scmp.lt.u32.totalorder %s912_s7, %s1301_s11 }
 0x18b   : > { %p914_p11 = pnand %p913_p9, %p1409_p0 }
 0x18c   : > { %p919_p5 = por %p918_p13, %p917_p6 }
 0x18d   : > { %p915_p3 = pneg %p914_p11 }
 0x18e   : > { %p921_p7 = por %p920_p8, %p919_p5 }
 0x190   : > { %p922_p4 = pnand %p921_p7, %p915_p3 }
 0x192   : > { %925 = shalt.err (!%p922_p4)
}
 0x193   : > { %756 = dma.vmem_to_hbm [thread:$0]  (%p1409_p0), %s1303_s6, 16, %s1301_s11, %s556_s21  }
 0x194   : > { %s751_s8 = spop %750  ;;  %s1334_s9 = scalar_lea.hbm %s1386_s3, %s742_s24 }
 0x195   : > { %v553_v35 = vstv %s751_s8  ;;  %s560_s7 = scalar_lea.sflag [#allocation11], %s1193_s23  ;;  %s926_s22 = scalar_lea.vmem %s1305_s5, 16 }
 0x196   : > { %554 = vst [vmem:[%s282_s4] sm:$0x1] %v553_v35  ;;  %p927_p10 = scmp.ne.s32.totalorder %s1305_s5, %s926_s22  ;;  %s1024_s29 = smov [#allocation10]  }
 0x197   : > { %s930_s18 = sshll.u32 %s1024_s29, 4  ;;  %s931_s18 = int_to_ptr.vmem [resolvable:$false] %s930_s18 }
 0x198   : > { %p928_p12 = pnand %p927_p10, %p1409_p0  ;;  %s932_s6 = scalar_lea.vmem %s931_s18, 32 }
 0x199   : > { %p933_p2 = scmp.lt.s32.totalorder %s1305_s5, %s931_s18  ;;  %p934_p9 = scmp.lt.s32.totalorder %s932_s6, %s926_s22 }
 0x19a   : > { %p929_p1 = pneg %p928_p12 }
 0x19b   : > { %p935_p11 = por %p934_p9, %p933_p2 }
 0x19d   : > { %p936_p3 = pnand %p935_p11, %p929_p1 }
 0x19f   : > { %939 = shalt.err (!%p936_p3)
}
 0x1a0   : > { %s940_s15 = scalar_lea.hbm %s1334_s9, 16  ;;  %s944_s4 = scalar_lea.hbm %s1386_s3, 32 }
 0x1a1   : > { %p941_p6 = scmp.ne.s32.totalorder %s1334_s9, %s940_s15  ;;  %p945_p8 = scmp.lt.u32.totalorder %s1334_s9, %s1386_s3 }
 0x1a2   : > { %p946_p7 = scmp.lt.u32.totalorder %s944_s4, %s940_s15  ;;  %p948_p10 = scmp.lt.u32.totalorder %s940_s15, %s1334_s9 }
 0x1a3   : > { %p942_p13 = pnand %p941_p6, %p1409_p0 }
 0x1a4   : > { %p947_p4 = por %p946_p7, %p945_p8 }
 0x1a5   : > { %p943_p5 = pneg %p942_p13 }
 0x1a6   : > { %p949_p12 = por %p948_p10, %p947_p4 }
 0x1a8   : > { %p950_p1 = pnand %p949_p12, %p943_p5 }
 0x1aa   : > { %953 = shalt.err (!%p950_p1)
}
 0x1ab   : > { %757 = dma.vmem_to_hbm [thread:$0]  (%p1409_p0), %s1305_s5, 16, %s1334_s9, %s560_s7  }
 0x1ac PF: > { %s601_s28 = sand.u32 1, %s996_s12   ;;  %p1410_p2 = scmp.ne.s32.totalorder %s1392_s27, 0 }
 0x1ad   : > { %p1411_p9 = scmp.ge.s32.totalorder %s1016_s17, 2  ;;  %s602_s19 = scalar_lea.sflag [#allocation6], %s601_s28 }
 0x1af   : > { %p768_p11 = pnand %p1411_p9, %p1410_p2 }
 0x1b1   : > { %987 = dma.done.wait (!%p768_p11), %s602_s19, 16  }
 0x1b2   : > { %989 = vsyncadd (!%p768_p11), %s602_s19, 4294967280  ;;  %s610_s8 = scalar_lea.sflag [#allocation11], %s601_s28 }
 0x1b3   : > { %991 = dma.done.wait (!%p768_p11), %s610_s8, 16  }
 0x1b4   : > { %993 = vsyncadd (!%p768_p11), %s610_s8, 4294967280  ;;  %s26_s17 = sadd.s32 1, %s1016_s17   ;;  %s1412_s12 = smov %s1000_s13 }
 0x1b5   : > { %p23_p3 = scmp.ge.s32.totalorder %s26_s17, 4   ;;  %s1413_s13 = smov %s1004_s14 }
 0x1b6   : > { %s1414_s14 = smov %s1101_s26  ;;  %s1415_s15 = smov %s1012_s16 }
 0x1b7   : > { %s1416_s16 = smov %s1418_s20  ;;  %25 = sbr.rel (!%p23_p3) target bundleno = 10 (0xa), region = 111 }
 0x1be   :  { %614 = vsyncpa [#allocation5], 1 }
 0x1bf   :  { %616 = vsyncpa [#allocation5 + $0x1], 1 }
 0x1c0   :  { %617 = vsyncpa [#allocation8], 1 }
 0x1c1   :  { %619 = vsyncpa [#allocation8 + $0x1], 1 }
 0x1c2   :  { %620 = vsyncpa [#allocation6], 1 }
 0x1c3   :  { %622 = vsyncpa [#allocation6 + $0x1], 1 }
 0x1c4   :  { %623 = vsyncpa [#allocation11], 1 }
 0x1c5   :  { %625 = vsyncpa [#allocation11 + $0x1], 1 }

</bundles_post_ra>
